<compile_context>
chip_gen: v5e
topology: v5e:2x2
jax: 0.10.0
libtpu: 0.0.40
codegen_flags: <defaults>
</compile_context>

<pallas_src>
import functools

import jax
import jax.numpy as jnp
from jax.experimental import pallas as pl
from jax.experimental.pallas import tpu as pltpu

# TODO(synk): utils.DEFAULT_MISSING_VALUE is not available in this context;
# assume 0.0 for the synthetic left-padding value.
DEFAULT_MISSING_VALUE = 0.0

_SUBLANE = 8  # f32 sublane tile


def _pad8(n):
    return -(-n // _SUBLANE) * _SUBLANE


def _elu(x):
    # ELU(alpha=1): x if x > 0 else exp(x) - 1.
    return jnp.where(x > 0, x, jnp.exp(x) - 1.0)


# ----------------------------------------------------------------------------
# Fused kernel builder
# ----------------------------------------------------------------------------
def _build_fused_kernel(plan):
    """plan: tuple of ops, each
         ('conv', dilation, l_out, apply_elu)  or  ('res',)
       Weight refs appear in the same order as the ops:
         conv         -> (w_cat (Cout, 2*Cin_p), b (Cout, 1))
         resnet block -> (w1 (C_p, C_p), b1 (C_p, 1), w2 (C_p, C_p), b2 (C_p, 1))
    """

    def kernel(*refs):
        x_ref = refs[0]
        o_ref = refs[-1]
        w_refs = refs[1:-1]

        h = x_ref[0]                              # (C_p, L), time on lanes
        wi = 0
        for op in plan:
            if op[0] == 'conv':
                _, d, l_out, apply_elu = op
                w = w_refs[wi][...]               # (Cout, 2*Cin_p)
                b = w_refs[wi + 1][...]           # (Cout, 1)
                wi += 2
                # kernel_size=2 dilated conv == single K=2*Cin contraction
                # against the two lane-shifted taps stacked on sublanes.
                taps = jnp.concatenate(
                    [h[:, :l_out], h[:, d:d + l_out]], axis=0)
                h = jnp.dot(w, taps, preferred_element_type=jnp.float32) + b
                if apply_elu:
                    h = _elu(h)
            else:  # ResNetBlock1d: elu(x + conv2(elu(conv1(x))))
                w1 = w_refs[wi][...]
                b1 = w_refs[wi + 1][...]
                w2 = w_refs[wi + 2][...]
                b2 = w_refs[wi + 3][...]
                wi += 4
                t = _elu(jnp.dot(w1, h, preferred_element_type=jnp.float32) + b1)
                t = jnp.dot(w2, t, preferred_element_type=jnp.float32) + b2
                h = _elu(h + t)

        o_ref[0] = h.astype(o_ref.dtype)

    return kernel


def _make_plan(ops, weights, l_in):
    """Attach static output lengths to each conv op; return (plan, L_out, C_out)."""
    plan = []
    l = l_in
    wi = 0
    c_out = None
    for op in ops:
        if op[0] == 'conv':
            _, d, apply_elu = op
            l = l - d
            plan.append(('conv', d, l, apply_elu))
            c_out = weights[wi].shape[0]
            wi += 2
        else:
            plan.append(('res',))
            wi += 4
    return tuple(plan), l, c_out


# ----------------------------------------------------------------------------
# One-time parameter preparation (hoisted padding / transposes / tap stacking)
# ----------------------------------------------------------------------------
def prepare_model(params):
    """Flatten torch-layout weights into kernel-ready, sublane-padded 2-D arrays
    plus a static op plan."""
    depth = len(params['middle']) + 2
    ops = []
    weights = []

    def add_conv(w, b, dilation, apply_elu, pad_out):
        cout, cin, k = w.shape
        assert k == 2
        cin_p = _pad8(cin)
        cout_p = _pad8(cout) if pad_out else cout
        w0 = jnp.zeros((cout_p, cin_p), w.dtype).at[:cout, :cin].set(w[:, :, 0])
        w1 = jnp.zeros((cout_p, cin_p), w.dtype).at[:cout, :cin].set(w[:, :, 1])
        bb = jnp.zeros((cout_p, 1), b.dtype).at[:cout, 0].set(b)
        weights.extend([jnp.concatenate([w0, w1], axis=1), bb])
        ops.append(('conv', dilation, apply_elu))

    def add_block(blk):
        c = blk['w1'].shape[0]
        c_p = _pad8(c)

        def pad_w(w):
            return jnp.zeros((c_p, c_p), w.dtype).at[:c, :c].set(w[:, :, 0])

        def pad_b(b):
            return jnp.zeros((c_p, 1), b.dtype).at[:c, 0].set(b)

        weights.extend([pad_w(blk['w1']), pad_b(blk['b1']),
                        pad_w(blk['w2']), pad_b(blk['b2'])])
        ops.append(('res',))

    add_conv(params['first']['w'], params['first']['b'], 1, True, True)
    for blk in params['first_blocks']:
        add_block(blk)
    for i, layer in enumerate(params['middle']):
        add_conv(layer['conv']['w'], layer['conv']['b'], 2 ** (i + 1), True, True)
        for blk in layer['blocks']:
            add_block(blk)
    # Last conv keeps its true output rows (no external slice needed).
    add_conv(params['last']['w'], params['last']['b'], 2 ** (depth - 1),
             False, False)

    return {'ops': tuple(ops),
            'weights': tuple(weights),
            'out_param': params['out_param']}


# ----------------------------------------------------------------------------
# Forward pass (single fused pallas_call, jit'ed)
# ----------------------------------------------------------------------------
@functools.partial(jax.jit, static_argnames=('ops', 'needed_last'))
def _fused_forward(weights, out_param, x, *, ops, needed_last):
    B, c_in, _ = x.shape
    c_in_pad = _pad8(c_in)
    pad_t = needed_last - 1 if needed_last > 1 else 0
    pad_c = c_in_pad - c_in
    if pad_t or pad_c:
        # DEFAULT_MISSING_VALUE == 0.0, so a single zero-pad covers both the
        # temporal left pad and the channel-alignment pad.  (The first conv's
        # padded weight columns are zero, so the channel pad never leaks.)
        x = jnp.pad(x, ((0, 0), (0, pad_c), (pad_t, 0)),
                    constant_values=DEFAULT_MISSING_VALUE)
    L = x.shape[2]

    plan, l_out, c_out = _make_plan(ops, weights, L)
    kernel = _build_fused_kernel(plan)

    in_specs = [pl.BlockSpec((1, c_in_pad, L), lambda b: (b, 0, 0))]
    in_specs += [pl.BlockSpec(w.shape, lambda b: (0, 0)) for w in weights]

    seq_state = pl.pallas_call(
        kernel,
        out_shape=jax.ShapeDtypeStruct((B, c_out, l_out), x.dtype),
        grid=(B,),
        in_specs=in_specs,
        out_specs=pl.BlockSpec((1, c_out, l_out), lambda b: (b, 0, 0)),
        compiler_params=pltpu.CompilerParams(
            dimension_semantics=("parallel",)),
    )(x, *weights)

    return seq_state, out_param[-needed_last:]


def recognition_wavenet_forward(model, x, needed_last):
    """x: (B, obs_dim, T) in PyTorch NCL layout. Returns (seq_state, out_param)."""
    return _fused_forward(model['weights'], model['out_param'], x,
                          ops=model['ops'], needed_last=needed_last)


# ----------------------------------------------------------------------------
# Parameter construction (deterministic, synthetic)
# ----------------------------------------------------------------------------
def init_params(key, latent_dim, obs_dim, nfilters, depth,
                additional_convs_per_layer, encoded_len):
    assert encoded_len <= 2 ** depth

    def conv_w(k, cout, cin, ksize):
        scale = 1.0 / jnp.sqrt(cin * ksize)
        return scale * jax.random.normal(k, (cout, cin, ksize), jnp.float32)

    def conv_b(k, cout):
        return 0.01 * jax.random.normal(k, (cout,), jnp.float32)

    keys = iter(jax.random.split(key, 256))

    def make_block():
        return {
            'w1': conv_w(next(keys), nfilters, nfilters, 1),
            'b1': conv_b(next(keys), nfilters),
            'w2': conv_w(next(keys), nfilters, nfilters, 1),
            'b2': conv_b(next(keys), nfilters),
        }

    params = {
        'first': {'w': conv_w(next(keys), nfilters, obs_dim, 2),
                  'b': conv_b(next(keys), nfilters)},
        'first_blocks': [make_block() for _ in range(additional_convs_per_layer)],
        'middle': [],
        'last': {'w': conv_w(next(keys), latent_dim * 2, nfilters, 2),
                 'b': conv_b(next(keys), latent_dim * 2)},
    }
    for _ in range(1, depth - 1):
        params['middle'].append({
            'conv': {'w': conv_w(next(keys), nfilters, nfilters, 2),
                     'b': conv_b(next(keys), nfilters)},
            'blocks': [make_block() for _ in range(additional_convs_per_layer)],
        })

    # out_param ~ xavier_normal on shape (encoded_len, latent_dim^2+latent_dim, 1)
    fan_in = (latent_dim * latent_dim + latent_dim) * 1
    fan_out = encoded_len * 1
    xavier_std = jnp.sqrt(2.0 / (fan_in + fan_out))
    params['out_param'] = xavier_std * jax.random.normal(
        next(keys), (encoded_len, latent_dim * latent_dim + latent_dim, 1),
        jnp.float32)
    return params


# ----------------------------------------------------------------------------
# Pure-JAX reference (mirrors RecognitionWaveNet.forward) for a smoke check
# ----------------------------------------------------------------------------
def _ref_forward(params, x, needed_last, depth):
    if needed_last > 1:
        pad = jnp.full((x.shape[0], x.shape[1], needed_last - 1),
                       DEFAULT_MISSING_VALUE, dtype=x.dtype)
        x = jnp.concatenate([pad, x], axis=2)

    def conv2(h, w, b, d):
        l_out = h.shape[2] - d
        return (jnp.einsum('oc,bcl->bol', w[:, :, 0], h[:, :, :l_out])
                + jnp.einsum('oc,bcl->bol', w[:, :, 1], h[:, :, d:d + l_out])
                + b[None, :, None])

    def res(h, blk):
        t = _elu(jnp.einsum('oc,bcl->bol', blk['w1'][:, :, 0], h)
                 + blk['b1'][None, :, None])
        t = (jnp.einsum('oc,bcl->bol', blk['w2'][:, :, 0], t)
             + blk['b2'][None, :, None])
        return _elu(h + t)

    h = _elu(conv2(x, params['first']['w'], params['first']['b'], 1))
    for blk in params['first_blocks']:
        h = res(h, blk)
    for i, layer in enumerate(params['middle']):
        h = _elu(conv2(h, layer['conv']['w'], layer['conv']['b'], 2 ** (i + 1)))
        for blk in layer['blocks']:
            h = res(h, blk)
    h = conv2(h, params['last']['w'], params['last']['b'], 2 ** (depth - 1))
    return h, params['out_param'][-needed_last:]


if __name__ == "__main__":
    # Small, consistent configuration.
    latent_dim = 3
    obs_dim = 4
    nfilters = 8
    depth = 3
    additional_convs_per_layer = 1
    encoded_len = 8              # <= 2 ** depth
    needed_last = 2

    B = 2
    T = 2 ** depth               # matches `recognize`-style input length

    key = jax.random.PRNGKey(0)
    pkey, xkey = jax.random.split(key)
    params = init_params(pkey, latent_dim, obs_dim, nfilters, depth,
                         additional_convs_per_layer, encoded_len)
    x = jax.random.normal(xkey, (B, obs_dim, T), jnp.float32)

    model = prepare_model(params)
    seq_state, out_param = recognition_wavenet_forward(model, x, needed_last)
    jax.block_until_ready(seq_state)
    jax.block_until_ready(out_param)

    # Output-length check: T + needed_last - 2^depth
    assert seq_state.shape == (B, 2 * latent_dim, T + needed_last - 2 ** depth)
    assert out_param.shape == (needed_last, latent_dim * latent_dim + latent_dim, 1)

    # Numerical smoke check against a pure-JAX reference.
    ref_seq, ref_out = _ref_forward(params, x, needed_last, depth)
    max_err = float(jnp.max(jnp.abs(seq_state - ref_seq)))
    assert jnp.allclose(seq_state, ref_seq, atol=1e-2, rtol=1e-2), max_err
    assert jnp.allclose(out_param, ref_out)

    print("KERNEL_OK")
</pallas_src>

<mosaic_0001>
module attributes {stable_mosaic.version = 11 : i64} {
  func.func @kernel(%arg0: i32, %arg1: memref<1x8x9xf32, #tpu.memory_space<vmem>>, %arg2: memref<8x16xf32, #tpu.memory_space<vmem>>, %arg3: memref<8x1xf32, #tpu.memory_space<vmem>>, %arg4: memref<8x8xf32, #tpu.memory_space<vmem>>, %arg5: memref<8x1xf32, #tpu.memory_space<vmem>>, %arg6: memref<8x8xf32, #tpu.memory_space<vmem>>, %arg7: memref<8x1xf32, #tpu.memory_space<vmem>>, %arg8: memref<8x16xf32, #tpu.memory_space<vmem>>, %arg9: memref<8x1xf32, #tpu.memory_space<vmem>>, %arg10: memref<8x8xf32, #tpu.memory_space<vmem>>, %arg11: memref<8x1xf32, #tpu.memory_space<vmem>>, %arg12: memref<8x8xf32, #tpu.memory_space<vmem>>, %arg13: memref<8x1xf32, #tpu.memory_space<vmem>>, %arg14: memref<6x16xf32, #tpu.memory_space<vmem>>, %arg15: memref<6x1xf32, #tpu.memory_space<vmem>>, %arg16: memref<1x6x2xf32, #tpu.memory_space<vmem>>) attributes {dimension_semantics = [#tpu.dimension_semantics<parallel>], iteration_bounds = array<i64: 2>, scalar_prefetch = 0 : i64, scratch_operands = 0 : i64, tpu.core_type = #tpu.core_type<tc>, window_params = [{transform_indices = @transform_0, window_bounds = array<i64: 1, 8, 9>}, {pipeline_mode = #tpu.pipeline_mode<synchronous>, transform_indices = @transform_1, window_bounds = array<i64: 8, 16>}, {pipeline_mode = #tpu.pipeline_mode<synchronous>, transform_indices = @transform_2, window_bounds = array<i64: 8, 1>}, {pipeline_mode = #tpu.pipeline_mode<synchronous>, transform_indices = @transform_3, window_bounds = array<i64: 8, 8>}, {pipeline_mode = #tpu.pipeline_mode<synchronous>, transform_indices = @transform_4, window_bounds = array<i64: 8, 1>}, {pipeline_mode = #tpu.pipeline_mode<synchronous>, transform_indices = @transform_5, window_bounds = array<i64: 8, 8>}, {pipeline_mode = #tpu.pipeline_mode<synchronous>, transform_indices = @transform_6, window_bounds = array<i64: 8, 1>}, {pipeline_mode = #tpu.pipeline_mode<synchronous>, transform_indices = @transform_7, window_bounds = array<i64: 8, 16>}, {pipeline_mode = #tpu.pipeline_mode<synchronous>, transform_indices = @transform_8, window_bounds = array<i64: 8, 1>}, {pipeline_mode = #tpu.pipeline_mode<synchronous>, transform_indices = @transform_9, window_bounds = array<i64: 8, 8>}, {pipeline_mode = #tpu.pipeline_mode<synchronous>, transform_indices = @transform_10, window_bounds = array<i64: 8, 1>}, {pipeline_mode = #tpu.pipeline_mode<synchronous>, transform_indices = @transform_11, window_bounds = array<i64: 8, 8>}, {pipeline_mode = #tpu.pipeline_mode<synchronous>, transform_indices = @transform_12, window_bounds = array<i64: 8, 1>}, {pipeline_mode = #tpu.pipeline_mode<synchronous>, transform_indices = @transform_13, window_bounds = array<i64: 6, 16>}, {pipeline_mode = #tpu.pipeline_mode<synchronous>, transform_indices = @transform_14, window_bounds = array<i64: 6, 1>}, {transform_indices = @transform_15, window_bounds = array<i64: 1, 6, 2>}]} {
    %c0 = arith.constant 0 : index
    %c0_0 = arith.constant 0 : index
    %c0_1 = arith.constant 0 : index
    %0 = vector.load %arg1[%c0, %c0_0, %c0_1] : memref<1x8x9xf32, #tpu.memory_space<vmem>>, vector<1x8x9xf32>
    %1 = vector.shape_cast %0 : vector<1x8x9xf32> to vector<8x9xf32>
    %c0_2 = arith.constant 0 : index
    %c0_3 = arith.constant 0 : index
    %2 = vector.load %arg2[%c0_2, %c0_3] : memref<8x16xf32, #tpu.memory_space<vmem>>, vector<8x16xf32>
    %c0_4 = arith.constant 0 : index
    %c0_5 = arith.constant 0 : index
    %3 = vector.load %arg3[%c0_4, %c0_5] : memref<8x1xf32, #tpu.memory_space<vmem>>, vector<8x1xf32>
    %4 = vector.extract_strided_slice %1 {offsets = [0, 0], sizes = [8, 8], strides = [1, 1]} : vector<8x9xf32> to vector<8x8xf32>
    %5 = vector.extract_strided_slice %1 {offsets = [0, 1], sizes = [8, 8], strides = [1, 1]} : vector<8x9xf32> to vector<8x8xf32>
    %6 = tpu.concatenate %4, %5 in 0 : vector<8x8xf32>, vector<8x8xf32> -> vector<16x8xf32>
    %cst = arith.constant dense<0.000000e+00> : vector<8x8xf32>
    %7 = tpu.matmul %2, %6, %cst {dimension_numbers = #tpu.dot_dimension_numbers<[1], [0], [0], [1], [0, 0, 1, 1], [], []>} : vector<8x16xf32>, vector<16x8xf32>, vector<8x8xf32> -> vector<8x8xf32>
    %8 = vector.broadcast %3 : vector<8x1xf32> to vector<8x8xf32>
    %9 = arith.addf %7, %8 : vector<8x8xf32>
    %cst_6 = arith.constant 0.000000e+00 : f32
    %10 = vector.broadcast %cst_6 : f32 to vector<8x8xf32>
    %11 = arith.cmpf ogt, %9, %10 : vector<8x8xf32>
    %12 = math.exp %9 : vector<8x8xf32>
    %cst_7 = arith.constant 1.000000e+00 : f32
    %13 = vector.broadcast %cst_7 : f32 to vector<8x8xf32>
    %14 = arith.subf %12, %13 : vector<8x8xf32>
    %15 = arith.select %11, %9, %14 : vector<8x8xi1>, vector<8x8xf32>
    %c0_8 = arith.constant 0 : index
    %c0_9 = arith.constant 0 : index
    %16 = vector.load %arg4[%c0_8, %c0_9] : memref<8x8xf32, #tpu.memory_space<vmem>>, vector<8x8xf32>
    %c0_10 = arith.constant 0 : index
    %c0_11 = arith.constant 0 : index
    %17 = vector.load %arg5[%c0_10, %c0_11] : memref<8x1xf32, #tpu.memory_space<vmem>>, vector<8x1xf32>
    %c0_12 = arith.constant 0 : index
    %c0_13 = arith.constant 0 : index
    %18 = vector.load %arg6[%c0_12, %c0_13] : memref<8x8xf32, #tpu.memory_space<vmem>>, vector<8x8xf32>
    %c0_14 = arith.constant 0 : index
    %c0_15 = arith.constant 0 : index
    %19 = vector.load %arg7[%c0_14, %c0_15] : memref<8x1xf32, #tpu.memory_space<vmem>>, vector<8x1xf32>
    %cst_16 = arith.constant dense<0.000000e+00> : vector<8x8xf32>
    %20 = tpu.matmul %16, %15, %cst_16 {dimension_numbers = #tpu.dot_dimension_numbers<[1], [0], [0], [1], [0, 0, 1, 1], [], []>} : vector<8x8xf32>, vector<8x8xf32>, vector<8x8xf32> -> vector<8x8xf32>
    %21 = vector.broadcast %17 : vector<8x1xf32> to vector<8x8xf32>
    %22 = arith.addf %20, %21 : vector<8x8xf32>
    %cst_17 = arith.constant 0.000000e+00 : f32
    %23 = vector.broadcast %cst_17 : f32 to vector<8x8xf32>
    %24 = arith.cmpf ogt, %22, %23 : vector<8x8xf32>
    %25 = math.exp %22 : vector<8x8xf32>
    %cst_18 = arith.constant 1.000000e+00 : f32
    %26 = vector.broadcast %cst_18 : f32 to vector<8x8xf32>
    %27 = arith.subf %25, %26 : vector<8x8xf32>
    %28 = arith.select %24, %22, %27 : vector<8x8xi1>, vector<8x8xf32>
    %cst_19 = arith.constant dense<0.000000e+00> : vector<8x8xf32>
    %29 = tpu.matmul %18, %28, %cst_19 {dimension_numbers = #tpu.dot_dimension_numbers<[1], [0], [0], [1], [0, 0, 1, 1], [], []>} : vector<8x8xf32>, vector<8x8xf32>, vector<8x8xf32> -> vector<8x8xf32>
    %30 = vector.broadcast %19 : vector<8x1xf32> to vector<8x8xf32>
    %31 = arith.addf %29, %30 : vector<8x8xf32>
    %32 = arith.addf %15, %31 : vector<8x8xf32>
    %cst_20 = arith.constant 0.000000e+00 : f32
    %33 = vector.broadcast %cst_20 : f32 to vector<8x8xf32>
    %34 = arith.cmpf ogt, %32, %33 : vector<8x8xf32>
    %35 = math.exp %32 : vector<8x8xf32>
    %cst_21 = arith.constant 1.000000e+00 : f32
    %36 = vector.broadcast %cst_21 : f32 to vector<8x8xf32>
    %37 = arith.subf %35, %36 : vector<8x8xf32>
    %38 = arith.select %34, %32, %37 : vector<8x8xi1>, vector<8x8xf32>
    %c0_22 = arith.constant 0 : index
    %c0_23 = arith.constant 0 : index
    %39 = vector.load %arg8[%c0_22, %c0_23] : memref<8x16xf32, #tpu.memory_space<vmem>>, vector<8x16xf32>
    %c0_24 = arith.constant 0 : index
    %c0_25 = arith.constant 0 : index
    %40 = vector.load %arg9[%c0_24, %c0_25] : memref<8x1xf32, #tpu.memory_space<vmem>>, vector<8x1xf32>
    %41 = vector.extract_strided_slice %38 {offsets = [0, 0], sizes = [8, 6], strides = [1, 1]} : vector<8x8xf32> to vector<8x6xf32>
    %42 = vector.extract_strided_slice %38 {offsets = [0, 2], sizes = [8, 6], strides = [1, 1]} : vector<8x8xf32> to vector<8x6xf32>
    %43 = tpu.concatenate %41, %42 in 0 : vector<8x6xf32>, vector<8x6xf32> -> vector<16x6xf32>
    %cst_26 = arith.constant dense<0.000000e+00> : vector<8x6xf32>
    %44 = tpu.matmul %39, %43, %cst_26 {dimension_numbers = #tpu.dot_dimension_numbers<[1], [0], [0], [1], [0, 0, 1, 1], [], []>} : vector<8x16xf32>, vector<16x6xf32>, vector<8x6xf32> -> vector<8x6xf32>
    %45 = vector.broadcast %40 : vector<8x1xf32> to vector<8x6xf32>
    %46 = arith.addf %44, %45 : vector<8x6xf32>
    %cst_27 = arith.constant 0.000000e+00 : f32
    %47 = vector.broadcast %cst_27 : f32 to vector<8x6xf32>
    %48 = arith.cmpf ogt, %46, %47 : vector<8x6xf32>
    %49 = math.exp %46 : vector<8x6xf32>
    %cst_28 = arith.constant 1.000000e+00 : f32
    %50 = vector.broadcast %cst_28 : f32 to vector<8x6xf32>
    %51 = arith.subf %49, %50 : vector<8x6xf32>
    %52 = arith.select %48, %46, %51 : vector<8x6xi1>, vector<8x6xf32>
    %c0_29 = arith.constant 0 : index
    %c0_30 = arith.constant 0 : index
    %53 = vector.load %arg10[%c0_29, %c0_30] : memref<8x8xf32, #tpu.memory_space<vmem>>, vector<8x8xf32>
    %c0_31 = arith.constant 0 : index
    %c0_32 = arith.constant 0 : index
    %54 = vector.load %arg11[%c0_31, %c0_32] : memref<8x1xf32, #tpu.memory_space<vmem>>, vector<8x1xf32>
    %c0_33 = arith.constant 0 : index
    %c0_34 = arith.constant 0 : index
    %55 = vector.load %arg12[%c0_33, %c0_34] : memref<8x8xf32, #tpu.memory_space<vmem>>, vector<8x8xf32>
    %c0_35 = arith.constant 0 : index
    %c0_36 = arith.constant 0 : index
    %56 = vector.load %arg13[%c0_35, %c0_36] : memref<8x1xf32, #tpu.memory_space<vmem>>, vector<8x1xf32>
    %cst_37 = arith.constant dense<0.000000e+00> : vector<8x6xf32>
    %57 = tpu.matmul %53, %52, %cst_37 {dimension_numbers = #tpu.dot_dimension_numbers<[1], [0], [0], [1], [0, 0, 1, 1], [], []>} : vector<8x8xf32>, vector<8x6xf32>, vector<8x6xf32> -> vector<8x6xf32>
    %58 = vector.broadcast %54 : vector<8x1xf32> to vector<8x6xf32>
    %59 = arith.addf %57, %58 : vector<8x6xf32>
    %cst_38 = arith.constant 0.000000e+00 : f32
    %60 = vector.broadcast %cst_38 : f32 to vector<8x6xf32>
    %61 = arith.cmpf ogt, %59, %60 : vector<8x6xf32>
    %62 = math.exp %59 : vector<8x6xf32>
    %cst_39 = arith.constant 1.000000e+00 : f32
    %63 = vector.broadcast %cst_39 : f32 to vector<8x6xf32>
    %64 = arith.subf %62, %63 : vector<8x6xf32>
    %65 = arith.select %61, %59, %64 : vector<8x6xi1>, vector<8x6xf32>
    %cst_40 = arith.constant dense<0.000000e+00> : vector<8x6xf32>
    %66 = tpu.matmul %55, %65, %cst_40 {dimension_numbers = #tpu.dot_dimension_numbers<[1], [0], [0], [1], [0, 0, 1, 1], [], []>} : vector<8x8xf32>, vector<8x6xf32>, vector<8x6xf32> -> vector<8x6xf32>
    %67 = vector.broadcast %56 : vector<8x1xf32> to vector<8x6xf32>
    %68 = arith.addf %66, %67 : vector<8x6xf32>
    %69 = arith.addf %52, %68 : vector<8x6xf32>
    %cst_41 = arith.constant 0.000000e+00 : f32
    %70 = vector.broadcast %cst_41 : f32 to vector<8x6xf32>
    %71 = arith.cmpf ogt, %69, %70 : vector<8x6xf32>
    %72 = math.exp %69 : vector<8x6xf32>
    %cst_42 = arith.constant 1.000000e+00 : f32
    %73 = vector.broadcast %cst_42 : f32 to vector<8x6xf32>
    %74 = arith.subf %72, %73 : vector<8x6xf32>
    %75 = arith.select %71, %69, %74 : vector<8x6xi1>, vector<8x6xf32>
    %c0_43 = arith.constant 0 : index
    %c0_44 = arith.constant 0 : index
    %76 = vector.load %arg14[%c0_43, %c0_44] : memref<6x16xf32, #tpu.memory_space<vmem>>, vector<6x16xf32>
    %c0_45 = arith.constant 0 : index
    %c0_46 = arith.constant 0 : index
    %77 = vector.load %arg15[%c0_45, %c0_46] : memref<6x1xf32, #tpu.memory_space<vmem>>, vector<6x1xf32>
    %78 = vector.extract_strided_slice %75 {offsets = [0, 0], sizes = [8, 2], strides = [1, 1]} : vector<8x6xf32> to vector<8x2xf32>
    %79 = vector.extract_strided_slice %75 {offsets = [0, 4], sizes = [8, 2], strides = [1, 1]} : vector<8x6xf32> to vector<8x2xf32>
    %80 = tpu.concatenate %78, %79 in 0 : vector<8x2xf32>, vector<8x2xf32> -> vector<16x2xf32>
    %cst_47 = arith.constant dense<0.000000e+00> : vector<6x2xf32>
    %81 = tpu.matmul %76, %80, %cst_47 {dimension_numbers = #tpu.dot_dimension_numbers<[1], [0], [0], [1], [0, 0, 1, 1], [], []>} : vector<6x16xf32>, vector<16x2xf32>, vector<6x2xf32> -> vector<6x2xf32>
    %82 = vector.broadcast %77 : vector<6x1xf32> to vector<6x2xf32>
    %83 = arith.addf %81, %82 : vector<6x2xf32>
    %c0_48 = arith.constant 0 : index
    %c0_49 = arith.constant 0 : index
    %c0_50 = arith.constant 0 : index
    %84 = vector.load %arg16[%c0_48, %c0_49, %c0_50] : memref<1x6x2xf32, #tpu.memory_space<vmem>>, vector<1x6x2xf32>
    %85 = vector.shape_cast %84 : vector<1x6x2xf32> to vector<6x2xf32>
    %86 = vector.shape_cast %83 : vector<6x2xf32> to vector<1x6x2xf32>
    tpu.vector_store %arg16[%c0_48, %c0_49, %c0_50], %86 {strides = array<i32>} : memref<1x6x2xf32, #tpu.memory_space<vmem>>, vector<1x6x2xf32>,
    return
  }
  func.func @transform_0(%arg0: i32) -> (i32, i32, i32) {
    %c0_i32 = arith.constant 0 : i32
    %c0_i32_0 = arith.constant 0 : i32
    %c0_i32_1 = arith.constant 0 : i32
    return %arg0, %c0_i32, %c0_i32_0 : i32, i32, i32
  }
  func.func @transform_1(%arg0: i32) -> (i32, i32) {
    %c0_i32 = arith.constant 0 : i32
    %c0_i32_0 = arith.constant 0 : i32
    %c0_i32_1 = arith.constant 0 : i32
    return %c0_i32, %c0_i32_0 : i32, i32
  }
  func.func @transform_2(%arg0: i32) -> (i32, i32) {
    %c0_i32 = arith.constant 0 : i32
    %c0_i32_0 = arith.constant 0 : i32
    %c0_i32_1 = arith.constant 0 : i32
    return %c0_i32, %c0_i32_0 : i32, i32
  }
  func.func @transform_3(%arg0: i32) -> (i32, i32) {
    %c0_i32 = arith.constant 0 : i32
    %c0_i32_0 = arith.constant 0 : i32
    %c0_i32_1 = arith.constant 0 : i32
    return %c0_i32, %c0_i32_0 : i32, i32
  }
  func.func @transform_4(%arg0: i32) -> (i32, i32) {
    %c0_i32 = arith.constant 0 : i32
    %c0_i32_0 = arith.constant 0 : i32
    %c0_i32_1 = arith.constant 0 : i32
    return %c0_i32, %c0_i32_0 : i32, i32
  }
  func.func @transform_5(%arg0: i32) -> (i32, i32) {
    %c0_i32 = arith.constant 0 : i32
    %c0_i32_0 = arith.constant 0 : i32
    %c0_i32_1 = arith.constant 0 : i32
    return %c0_i32, %c0_i32_0 : i32, i32
  }
  func.func @transform_6(%arg0: i32) -> (i32, i32) {
    %c0_i32 = arith.constant 0 : i32
    %c0_i32_0 = arith.constant 0 : i32
    %c0_i32_1 = arith.constant 0 : i32
    return %c0_i32, %c0_i32_0 : i32, i32
  }
  func.func @transform_7(%arg0: i32) -> (i32, i32) {
    %c0_i32 = arith.constant 0 : i32
    %c0_i32_0 = arith.constant 0 : i32
    %c0_i32_1 = arith.constant 0 : i32
    return %c0_i32, %c0_i32_0 : i32, i32
  }
  func.func @transform_8(%arg0: i32) -> (i32, i32) {
    %c0_i32 = arith.constant 0 : i32
    %c0_i32_0 = arith.constant 0 : i32
    %c0_i32_1 = arith.constant 0 : i32
    return %c0_i32, %c0_i32_0 : i32, i32
  }
  func.func @transform_9(%arg0: i32) -> (i32, i32) {
    %c0_i32 = arith.constant 0 : i32
    %c0_i32_0 = arith.constant 0 : i32
    %c0_i32_1 = arith.constant 0 : i32
    return %c0_i32, %c0_i32_0 : i32, i32
  }
  func.func @transform_10(%arg0: i32) -> (i32, i32) {
    %c0_i32 = arith.constant 0 : i32
    %c0_i32_0 = arith.constant 0 : i32
    %c0_i32_1 = arith.constant 0 : i32
    return %c0_i32, %c0_i32_0 : i32, i32
  }
  func.func @transform_11(%arg0: i32) -> (i32, i32) {
    %c0_i32 = arith.constant 0 : i32
    %c0_i32_0 = arith.constant 0 : i32
    %c0_i32_1 = arith.constant 0 : i32
    return %c0_i32, %c0_i32_0 : i32, i32
  }
  func.func @transform_12(%arg0: i32) -> (i32, i32) {
    %c0_i32 = arith.constant 0 : i32
    %c0_i32_0 = arith.constant 0 : i32
    %c0_i32_1 = arith.constant 0 : i32
    return %c0_i32, %c0_i32_0 : i32, i32
  }
  func.func @transform_13(%arg0: i32) -> (i32, i32) {
    %c0_i32 = arith.constant 0 : i32
    %c0_i32_0 = arith.constant 0 : i32
    %c0_i32_1 = arith.constant 0 : i32
    return %c0_i32, %c0_i32_0 : i32, i32
  }
  func.func @transform_14(%arg0: i32) -> (i32, i32) {
    %c0_i32 = arith.constant 0 : i32
    %c0_i32_0 = arith.constant 0 : i32
    %c0_i32_1 = arith.constant 0 : i32
    return %c0_i32, %c0_i32_0 : i32, i32
  }
  func.func @transform_15(%arg0: i32) -> (i32, i32, i32) {
    %c0_i32 = arith.constant 0 : i32
    %c0_i32_0 = arith.constant 0 : i32
    %c0_i32_1 = arith.constant 0 : i32
    return %arg0, %c0_i32, %c0_i32_0 : i32, i32, i32
  }
}

</mosaic_0001>

<bundles_post_ra>
// kernel: _fused_forward.1
= control target key start
LH: loop header
LB: loop body
LE: loop exit
PB: predicated region body
PF: predicated region fallthrough
CT: control target
= control target key end

     0   :  { %s943_s18 = smov 0   ;;  %s1016_s0 = inlined_call_operand.vmem [shape: f32[2,8,9], index: 0, kind: input, shape index: {}]   ;;  %s1017_s1 = inlined_call_operand.vmem [shape: f32[8,16], index: 1, kind: input, shape index: {}]   ;;  %s1018_s2 = inlined_call_operand.vmem [shape: f32[8,1], index: 2, kind: input, shape index: {}]   ;;  %s1019_s3 = inlined_call_operand.vmem [shape: f32[8,8], index: 3, kind: input, shape index: {}]   ;;  %s1020_s4 = inlined_call_operand.vmem [shape: f32[8,1], index: 4, kind: input, shape index: {}]   ;;  %s1021_s5 = inlined_call_operand.vmem [shape: f32[8,8], index: 5, kind: input, shape index: {}]   ;;  %s1022_s6 = inlined_call_operand.vmem [shape: f32[8,1], index: 6, kind: input, shape index: {}]   ;;  %s1023_s7 = inlined_call_operand.vmem [shape: f32[8,16], index: 7, kind: input, shape index: {}]   ;;  %s1024_s8 = inlined_call_operand.vmem [shape: f32[8,1], index: 8, kind: input, shape index: {}]   ;;  %s1025_s9 = inlined_call_operand.vmem [shape: f32[8,8], index: 9, kind: input, shape index: {}]   ;;  %s1026_s10 = inlined_call_operand.vmem [shape: f32[8,1], index: 10, kind: input, shape index: {}]   ;;  %s1027_s11 = inlined_call_operand.vmem [shape: f32[8,8], index: 11, kind: input, shape index: {}]   ;;  %s1028_s12 = inlined_call_operand.vmem [shape: f32[8,1], index: 12, kind: input, shape index: {}]   ;;  %s1029_s13 = inlined_call_operand.vmem [shape: f32[6,16], index: 13, kind: input, shape index: {}]   ;;  %s1030_s14 = inlined_call_operand.vmem [shape: f32[6,1], index: 14, kind: input, shape index: {}]   ;;  %s1031_s15 = inlined_call_operand.vmem [shape: f32[2,6,2], index: 15, kind: output, shape index: {}]  }
   0x1 LB: > { %s802_s19 = sadd.s32 4294967295, %s857_s18   ;;  %p806_p0 = scmp.ge.s32.totalorder %s857_s18, 1  ;;  %s857_s18 = sphi %s943_s18, %s25_s18  }
   0x2   : > { %p436_p1 = scmp.lt.s32.totalorder %s857_s18, 3 }
   0x4   : > { %p437_p2 = pnand %p806_p0, %p436_p1 }
   0x5   : > { %p482_p3 = scmp.lt.s32.totalorder (!%p437_p2), %s802_s19, 1  ;;  %s859_s24 = smov (!%p437_p2), 127  }
   0x6   : > { %440 = sbr.rel (%p437_p2) target bundleno = 1340 (0x53c), region = 80  ;;  %s861_s29 = smov (!%p437_p2), 126  }
   0x7   : > { %s862_s28 = smov (!%p437_p2), 124  }
   0xb   : > { %s1033_s19 = smov (!%p482_p3, %s802_s19), 1  ;;  %v492_v1 = vld [vmem:[%s1018_s2] sm:$0xff]  ;;  %v860_v2 = vmov 0   ;;  %vm502_vm0 = vcmask 130048   ;;  %vm540_vm2 = vcmask 64512   ;;  %vm747_vm8 = vcmask 13312  }
   0xc   : > { %s807_s20 = sshll.u32 %s1033_s19, 3  ;;  %836 = vset.pattern.permute.xlu0 %v860_v2  ;;  %837 = vset.pattern.permute.xlu1 %v860_v2  ;;  %v491_v4 = vld [vmem:[%s1017_s1] sm:$0xff] }
   0xd   : > { %s485_s23 = scalar_lea.vmem %s1016_s0, %s807_s20  ;;  %838 = vset.pattern.permute.xlu2 %v860_v2  ;;  %v532_v5 = vld [vmem:[%s1020_s4] sm:$0xff]  ;;  %s489_s21 = scalar_lea.vmem %s1031_s15, %s807_s20 }
   0xe   : > { %v490_v0 = vld [vmem:[%s485_s23] sm:$0xff]  ;;  %537 = vperm.xlu1 %837, %v532_v5  }
   0xf   : > { %494 = vrot.lane.b32.xlu0 %v490_v0, %s859_s24  ;;  %v534_v6 = vld [vmem:[%s1022_s6] sm:$0xff] }
  0x10   : > { %v643_v7 = vld [vmem:[%s1026_s10] sm:$0xff] }
  0x11   : > { %v714_v8 = vld [vmem:[%s1030_s14] sm:$0x3f] }
  0x12   : > { %v531_v15 = vld [vmem:[%s1019_s3] sm:$0xff] }
  0x13   : > { %v533_v23 = vld [vmem:[%s1021_s5] sm:$0xff] }
  0x14   : > { %v604_v33 = vld [vmem:[%s1024_s8] sm:$0xff] }
  0x15   : > { %v645_v34 = vld [vmem:[%s1028_s12] sm:$0xff] }
  0x16   : > { %571 = vperm.xlu1 %837, %v534_v6   ;;  %v603_v36 = vld [vmem:[%s1023_s7] sm:$0xff] }
  0x17   : > { %499 = vperm.xlu0 %836, %v492_v1   ;;  %v642_v43 = vld [vmem:[%s1025_s9] sm:$0xff] }
  0x18   : > { %v644_v51 = vld [vmem:[%s1027_s11] sm:$0xff] }
  0x19   : > { %v713_v62 = vld [vmem:[%s1029_s13] sm:$0x3f] }
  0x1e   : > { %648 = vperm.xlu1 %837, %v643_v7  }
  0x26   : > { %721 = vperm.xlu1 %837, %v714_v8  }
  0x80   : > { %v538_v17 = vpop.permute.xlu1 %537 }
  0x81   : > { %v495_v3 = vpop.permute.xlu0 %494 }
  0x82   : > { %520 = vmatpush.msra.mxu0 %v495_v3 }
  0x84   : > { %521 = vmatpush.msra.mxu0 %v490_v0 }
  0x85   : > { %809 = vmatmul.msk.f32.vlgmr.msra.gmra.mxu0 %vm502_vm0, %v491_v4 }
  0x88   : > { %v572_v25 = vpop.permute.xlu1 %571 }
  0x89   : > { %v500_v9 = vpop.permute.xlu0 %499 }
  0x90   : > { %v649_v45 = vpop.permute.xlu1 %648 }
  0x98   : > { %v722_v63 = vpop.permute.xlu1 %721 }
 0x102   : > { %v523_v10 = vpop.f32.mrf.mxu0 }
 0x103   : > { %v524_v11 = vadd.f32 %v523_v10, %v500_v9 }
 0x105   : > { %v527_v12 = vmul.f32 1.442695, %v524_v11  ;;  %vm526_vm1 = vcmp.gt.f32.partialorder %v524_v11, 0.0 }
 0x107   : > { %839 = vpow2.f32 %v527_v12 }
 0x10d   : > { %v840_v13 = vpop.eup %839 }
 0x10e   : > { %v810_v14 = vadd.f32 -1.0, %v840_v13 }
 0x110   : > { %v530_v16 = vsel %vm526_vm1, %v524_v11, %v810_v14 }
 0x111   : > { %559 = vmatpush.msra.mxu1 %v530_v16 }
 0x112   : > { %811 = vmatmul.msk.f32.vlgmr.msra.gmra.mxu1 %vm540_vm2, %v531_v15 }
 0x18f   : > { %v561_v18 = vpop.f32.mrf.mxu1 }
 0x190   : > { %v562_v19 = vadd.f32 %v561_v18, %v538_v17 }
 0x192   : > { %v565_v20 = vmul.f32 1.442695, %v562_v19  ;;  %vm564_vm3 = vcmp.gt.f32.partialorder %v562_v19, 0.0 }
 0x194   : > { %841 = vpow2.f32 %v565_v20 }
 0x19a   : > { %v842_v21 = vpop.eup %841 }
 0x19b   : > { %v812_v22 = vadd.f32 -1.0, %v842_v21 }
 0x19d   : > { %v568_v24 = vsel %vm564_vm3, %v562_v19, %v812_v22 }
 0x19e   : > { %592 = vmatpush.msra.mxu2 %v568_v24 }
 0x19f   : > { %813 = vmatmul.msk.f32.vlgmr.msra.gmra.mxu2 %vm540_vm2, %v533_v23 }
 0x222   : > { %v594_v26 = vpop.f32.mrf.mxu2 }
 0x223   : > { %v595_v27 = vadd.f32 %v594_v26, %v572_v25 }
 0x225   : > { %v597_v28 = vadd.f32 %v595_v27, %v530_v16 }
 0x227   : > { %v599_v29 = vmul.f32 1.442695, %v597_v28  ;;  %vm598_vm4 = vcmp.gt.f32.partialorder %v597_v28, 0.0 }
 0x229   : > { %843 = vpow2.f32 %v599_v29 }
 0x22f   : > { %v844_v30 = vpop.eup %843 }
 0x230   : > { %v814_v31 = vadd.f32 -1.0, %v844_v30 }
 0x232   : > { %v602_v32 = vsel %vm598_vm4, %v597_v28, %v814_v31 }
 0x233   : > { %606 = vrot.lane.b32.xlu2 %v602_v32, %s861_s29 }
 0x23b   : > { %611 = vperm.xlu2 %838, %v604_v33  }
 0x243   : > { %681 = vperm.xlu2 %838, %v645_v34  }
 0x28d   : > { %v607_v35 = vpop.permute.xlu2 %606 }
 0x28e   : > { %631 = vmatpush.msra.mxu3 %v607_v35 }
 0x290   : > { %632 = vmatpush.msra.mxu3 %v602_v32 }
 0x291   : > { %815 = vmatmul.msk.f32.vlgmr.msra.gmra.mxu3 %vm502_vm0, %v603_v36 }
 0x295   : > { %v612_v37 = vpop.permute.xlu2 %611 }
 0x29d   : > { %v682_v53 = vpop.permute.xlu2 %681 }
 0x314   : > { %v634_v38 = vpop.f32.mrf.mxu3 }
 0x315   : > { %v635_v39 = vadd.f32 %v634_v38, %v612_v37 }
 0x317   : > { %v638_v40 = vmul.f32 1.442695, %v635_v39  ;;  %vm637_vm5 = vcmp.gt.f32.partialorder %v635_v39, 0.0 }
 0x319   : > { %845 = vpow2.f32 %v638_v40 }
 0x31f   : > { %v846_v41 = vpop.eup %845 }
 0x320   : > { %v816_v42 = vadd.f32 -1.0, %v846_v41 }
 0x322   : > { %v641_v44 = vsel %vm637_vm5, %v635_v39, %v816_v42 }
 0x323   : > { %669 = vmatpush.msrb.mxu1 %v641_v44 }
 0x324   : > { %817 = vmatmul.msk.f32.vlgmr.msrb.gmra.mxu1 %vm540_vm2, %v642_v43 }
 0x3a1   : > { %v671_v46 = vpop.f32.mrf.mxu1 }
 0x3a2   : > { %v672_v47 = vadd.f32 %v671_v46, %v649_v45 }
 0x3a4   : > { %v675_v48 = vmul.f32 1.442695, %v672_v47  ;;  %vm674_vm6 = vcmp.gt.f32.partialorder %v672_v47, 0.0 }
 0x3a6   : > { %847 = vpow2.f32 %v675_v48 }
 0x3ac   : > { %v848_v49 = vpop.eup %847 }
 0x3ad   : > { %v818_v50 = vadd.f32 -1.0, %v848_v49 }
 0x3af   : > { %v678_v52 = vsel %vm674_vm6, %v672_v47, %v818_v50 }
 0x3b0   : > { %702 = vmatpush.msrb.mxu2 %v678_v52 }
 0x3b1   : > { %819 = vmatmul.msk.f32.vlgmr.msrb.gmra.mxu2 %vm540_vm2, %v644_v51 }
 0x434   : > { %v704_v54 = vpop.f32.mrf.mxu2 }
 0x435   : > { %v705_v55 = vadd.f32 %v704_v54, %v682_v53 }
 0x437   : > { %v707_v56 = vadd.f32 %v705_v55, %v641_v44 }
 0x439   : > { %v709_v57 = vmul.f32 1.442695, %v707_v56  ;;  %vm708_vm7 = vcmp.gt.f32.partialorder %v707_v56, 0.0 }
 0x43b   : > { %849 = vpow2.f32 %v709_v57 }
 0x441   : > { %v850_v58 = vpop.eup %849 }
 0x442   : > { %v820_v59 = vadd.f32 -1.0, %v850_v58 }
 0x444   : > { %v712_v60 = vsel %vm708_vm7, %v707_v56, %v820_v59 }
 0x445   : > { %716 = vrot.lane.b32.xlu0 %v712_v60, %s862_s28 }
 0x4b7   : > { %v717_v61 = vpop.permute.xlu0 %716 }
 0x4b8   : > { %741 = vmatpush.msrb.mxu0 %v717_v61 }
 0x4ba   : > { %742 = vmatpush.msrb.mxu0 %v712_v60 }
 0x4bb   : > { %821 = vmatmul.msk.f32.vlgmr.msrb.gmra.mxu0 %vm502_vm0, %v713_v62 }
 0x538   : > { %v744_v0 = vpop.f32.mrf.mxu0 }
 0x539   : > { %v745_v1 = vadd.f32 %v744_v0, %v722_v63 }
 0x53b   : > { %748 = vst.msk [vmem:[%s489_s21] sm:$0x3f] %vm747_vm8, %v745_v1 }
 0x53c PF: > { %s25_s18 = sadd.s32 1, %s857_s18  }
 0x53d   : > { %p22_p4 = scmp.ge.s32.totalorder %s25_s18, 4  }
 0x53f   :  { %24 = sbr.rel (!%p22_p4) target bundleno = 1 (0x1), region = 110 }

</bundles_post_ra>
